<compile_context>
chip_gen: v6e
topology: v6e:2x2x1
jax: 0.10.0
libtpu: 0.0.40
codegen_flags: <defaults>
</compile_context>

<pallas_src>
import jax
import jax.numpy as jnp
from jax.experimental import pallas as pl
from jax.experimental.pallas import tpu as pltpu


# ----------------------------- kernel ---------------------------------------

def _chunk_cat_linear_kernel(x_ref, w_ref, b_ref, o_ref, acc_ref):
    # x_ref: (tm, tk)  w_ref: (tk, tn)  b_ref: (1, tn)  o_ref: (tm, tn)
    # acc_ref: (tm, tn) f32 scratch, resident across the K grid axis.
    k = pl.program_id(2)

    @pl.when(k == 0)
    def _():
        acc_ref[...] = jnp.zeros_like(acc_ref)

    acc_ref[...] += jnp.dot(x_ref[...], w_ref[...],
                            preferred_element_type=jnp.float32)

    @pl.when(k == pl.num_programs(2) - 1)
    def _():
        o_ref[...] = (acc_ref[...] + b_ref[...]).astype(o_ref.dtype)


# ----------------------------- wrapper ---------------------------------------

def _round_up(a, b):
    return ((a + b - 1) // b) * b


def chunk_cat_linear(x, w, b, *, block_m=512, block_n=512, block_k=512,
                     compute_dtype=None):
    """y = x @ w + b  (== PyTorch Linear with weight w.T and bias b).

    x: (..., in_features)
    w: (in_features, out_features * chunk_size)   -- PyTorch weight, transposed
    b: (out_features * chunk_size,)
    """
    *lead, K = x.shape
    Kw, N = w.shape
    assert K == Kw, "in_features mismatch"
    out_dtype = x.dtype

    if compute_dtype is not None:
        # TODO(synk): for production, store w in compute_dtype persistently
        # (one-time cast at init) instead of re-casting per call here.
        x = x.astype(compute_dtype)
        w = w.astype(compute_dtype)

    M = 1
    for d in lead:
        M *= d
    x2 = x.reshape(M, K)
    b2 = b.reshape(1, N).astype(jnp.float32)   # bias added onto the f32 acc

    # Sublane packing: 8 rows per vreg at 32-bit, 16 at 16-bit.
    sub = 16 if jnp.dtype(x2.dtype).itemsize < 4 else 8

    # --- M tiling: large tile (multiple of 128 when possible), pad M up. ---
    tm = min(_round_up(block_m, 128), _round_up(M, sub))
    Mp = _round_up(M, tm)

    # --- N tiling: tn multiple of 128 (lane-dense unmasked stores), pad N up.
    tn = min(_round_up(block_n, 128), _round_up(N, 128))
    Np = _round_up(N, tn)

    # --- K tiling: single step if K fits a tile, else tile + pad with zeros.
    if K <= block_k:
        tk, Kp = K, K
    else:
        tk = _round_up(min(block_k, K), 128)
        Kp = _round_up(K, tk)

    # Zero-pad (zeros contribute nothing to the matmul; padded rows/cols of the
    # output are sliced off below).
    if Mp != M or Kp != K:
        x2 = jnp.pad(x2, ((0, Mp - M), (0, Kp - K)))
    if Kp != K or Np != N:
        w = jnp.pad(w, ((0, Kp - K), (0, Np - N)))
    if Np != N:
        b2 = jnp.pad(b2, ((0, 0), (0, Np - N)))

    grid = (Mp // tm, Np // tn, Kp // tk)

    # VMEM budget from the actual (double-buffered) tiles, with headroom;
    # clamped to 64 MiB so it remains valid on v7x.
    xb = jnp.dtype(x2.dtype).itemsize
    wb = jnp.dtype(w.dtype).itemsize
    ob = jnp.dtype(out_dtype).itemsize
    vmem_bytes = (2 * tm * tk * xb          # x tiles (double-buffered)
                  + 2 * tk * tn * wb        # weight tiles
                  + 2 * tn * 4              # bias tiles
                  + 2 * tm * tn * ob        # output tiles
                  + tm * tn * 4)            # f32 accumulator scratch
    vmem_limit = min(max(2 * vmem_bytes, 32 * 1024 * 1024), 64 * 1024 * 1024)

    cost = pl.CostEstimate(
        flops=2 * M * K * N + M * N,
        transcendentals=0,
        bytes_accessed=M * K * xb + K * N * wb + N * 4 + M * N * ob,
    )

    out = pl.pallas_call(
        _chunk_cat_linear_kernel,
        out_shape=jax.ShapeDtypeStruct((Mp, Np), out_dtype),
        grid_spec=pltpu.PrefetchScalarGridSpec(
            num_scalar_prefetch=0,
            grid=grid,
            in_specs=[
                pl.BlockSpec((tm, tk), lambda i, j, k: (i, k)),   # activations
                pl.BlockSpec((tk, tn), lambda i, j, k: (k, j)),   # weight tile
                pl.BlockSpec((1, tn), lambda i, j, k: (0, j)),    # bias tile
            ],
            out_specs=pl.BlockSpec((tm, tn), lambda i, j, k: (i, j)),
            scratch_shapes=[pltpu.VMEM((tm, tn), jnp.float32)],
        ),
        compiler_params=pltpu.CompilerParams(
            dimension_semantics=("parallel", "parallel", "arbitrary"),
            vmem_limit_bytes=int(vmem_limit),
        ),
        cost_estimate=cost,
    )(x2, w, b2)

    out = out[:M, :N]
    return out.reshape(*lead, N)


# ------------------------- pure-JAX reference --------------------------------

def chunk_cat_linear_ref(x, w, b):
    return x @ w + b


# ------------------------------- main ----------------------------------------

if __name__ == "__main__":
    key = jax.random.PRNGKey(0)

    # --- Test 1: module-sized shapes (N=64 < 128 exercises N padding). -------
    B, T = 2, 8
    in_features, out_features, chunk_size = 32, 16, 4
    N = out_features * chunk_size

    kx, kw, kb, key = *jax.random.split(key, 3), jax.random.split(key, 4)[3]
    x = jax.random.normal(kx, (B, T, in_features), dtype=jnp.float32)
    # PyTorch Linear computes x @ W.T + b; we store W.T directly as (K, N).
    w = jax.random.normal(kw, (in_features, N), dtype=jnp.float32) * 0.1
    b = jax.random.normal(kb, (N,), dtype=jnp.float32) * 0.1

    y = jax.block_until_ready(chunk_cat_linear(x, w, b))
    y_ref = chunk_cat_linear_ref(x, w, b)
    assert y.shape == (B, T, N)
    assert jnp.allclose(y, y_ref, atol=1e-4, rtol=1e-4), "mismatch (test 1)"

    # --- Test 2: K > block_k exercises the K grid axis + f32 accumulator. ----
    in_features2, out_features2, chunk_size2 = 640, 32, 8
    N2 = out_features2 * chunk_size2

    kx2, kw2, kb2 = jax.random.split(key, 3)
    x2 = jax.random.normal(kx2, (B, T, in_features2), dtype=jnp.float32)
    w2 = jax.random.normal(kw2, (in_features2, N2), dtype=jnp.float32) * 0.05
    b2 = jax.random.normal(kb2, (N2,), dtype=jnp.float32) * 0.05

    y2 = jax.block_until_ready(chunk_cat_linear(x2, w2, b2))
    y2_ref = chunk_cat_linear_ref(x2, w2, b2)
    assert y2.shape == (B, T, N2)
    assert jnp.allclose(y2, y2_ref, atol=2e-3, rtol=2e-3), "mismatch (test 2)"

    print("KERNEL_OK")
</pallas_src>

<mosaic_0001>
module attributes {stable_mosaic.version = 11 : i64} {
  func.func @_chunk_cat_linear_kernel(%arg0: i32, %arg1: i32, %arg2: i32, %arg3: memref<16x32xf32, #tpu.memory_space<vmem>>, %arg4: memref<32x128xf32, #tpu.memory_space<vmem>>, %arg5: memref<1x128xf32, #tpu.memory_space<vmem>>, %arg6: memref<16x128xf32, #tpu.memory_space<vmem>>, %arg7: memref<16x128xf32, #tpu.memory_space<vmem>>) attributes {dimension_semantics = [#tpu.dimension_semantics<parallel>, #tpu.dimension_semantics<parallel>, #tpu.dimension_semantics<arbitrary>], iteration_bounds = array<i64: 1, 1, 1>, scalar_prefetch = 0 : i64, scratch_operands = 1 : i64, tpu.core_type = #tpu.core_type<tc>, window_params = [{transform_indices = @transform_0, window_bounds = array<i64: 16, 32>}, {transform_indices = @transform_1, window_bounds = array<i64: 32, 128>}, {transform_indices = @transform_2, window_bounds = array<i64: 1, 128>}, {transform_indices = @transform_3, window_bounds = array<i64: 16, 128>}]} {
    %c0_i32 = arith.constant 0 : i32
    %0 = arith.cmpi eq, %arg2, %c0_i32 : i32
    %1 = arith.extui %0 : i1 to i32
    %c0_i32_0 = arith.constant 0 : i32
    %2 = arith.cmpi ne, %1, %c0_i32_0 : i32
    scf.if %2 {
      %cst_10 = arith.constant 0.000000e+00 : f32
      %12 = vector.broadcast %cst_10 : f32 to vector<16x128xf32>
      %c0_11 = arith.constant 0 : index
      %c0_12 = arith.constant 0 : index
      %13 = vector.load %arg7[%c0_11, %c0_12] : memref<16x128xf32, #tpu.memory_space<vmem>>, vector<16x128xf32>
      tpu.vector_store %arg7[%c0_11, %c0_12], %12 {strides = array<i32>} : memref<16x128xf32, #tpu.memory_space<vmem>>, vector<16x128xf32>,
    } else {
    }
    %c0 = arith.constant 0 : index
    %c0_1 = arith.constant 0 : index
    %3 = vector.load %arg7[%c0, %c0_1] : memref<16x128xf32, #tpu.memory_space<vmem>>, vector<16x128xf32>
    %c0_2 = arith.constant 0 : index
    %c0_3 = arith.constant 0 : index
    %4 = vector.load %arg3[%c0_2, %c0_3] : memref<16x32xf32, #tpu.memory_space<vmem>>, vector<16x32xf32>
    %c0_4 = arith.constant 0 : index
    %c0_5 = arith.constant 0 : index
    %5 = vector.load %arg4[%c0_4, %c0_5] : memref<32x128xf32, #tpu.memory_space<vmem>>, vector<32x128xf32>
    %cst = arith.constant dense<0.000000e+00> : vector<16x128xf32>
    %6 = tpu.matmul %4, %5, %cst {dimension_numbers = #tpu.dot_dimension_numbers<[1], [0], [0], [1], [0, 0, 1, 1], [], []>} : vector<16x32xf32>, vector<32x128xf32>, vector<16x128xf32> -> vector<16x128xf32>
    %7 = arith.addf %3, %6 : vector<16x128xf32>
    %c0_6 = arith.constant 0 : index
    %c0_7 = arith.constant 0 : index
    %8 = vector.load %arg7[%c0_6, %c0_7] : memref<16x128xf32, #tpu.memory_space<vmem>>, vector<16x128xf32>
    tpu.vector_store %arg7[%c0_6, %c0_7], %7 {strides = array<i32>} : memref<16x128xf32, #tpu.memory_space<vmem>>, vector<16x128xf32>,
    %c0_i32_8 = arith.constant 0 : i32
    %9 = arith.cmpi eq, %arg2, %c0_i32_8 : i32
    %10 = arith.extui %9 : i1 to i32
    %c0_i32_9 = arith.constant 0 : i32
    %11 = arith.cmpi ne, %10, %c0_i32_9 : i32
    scf.if %11 {
      %c0_10 = arith.constant 0 : index
      %c0_11 = arith.constant 0 : index
      %12 = vector.load %arg7[%c0_10, %c0_11] : memref<16x128xf32, #tpu.memory_space<vmem>>, vector<16x128xf32>
      %c0_12 = arith.constant 0 : index
      %c0_13 = arith.constant 0 : index
      %13 = vector.load %arg5[%c0_12, %c0_13] : memref<1x128xf32, #tpu.memory_space<vmem>>, vector<1x128xf32>
      %14 = vector.broadcast %13 : vector<1x128xf32> to vector<16x128xf32>
      %15 = arith.addf %12, %14 : vector<16x128xf32>
      %c0_14 = arith.constant 0 : index
      %c0_15 = arith.constant 0 : index
      %16 = vector.load %arg6[%c0_14, %c0_15] : memref<16x128xf32, #tpu.memory_space<vmem>>, vector<16x128xf32>
      tpu.vector_store %arg6[%c0_14, %c0_15], %15 {strides = array<i32>} : memref<16x128xf32, #tpu.memory_space<vmem>>, vector<16x128xf32>,
    } else {
    }
    return
  }
  func.func @transform_0(%arg0: i32, %arg1: i32, %arg2: i32) -> (i32, i32) {
    %c0_i32 = arith.constant 0 : i32
    return %arg0, %arg2 : i32, i32
  }
  func.func @transform_1(%arg0: i32, %arg1: i32, %arg2: i32) -> (i32, i32) {
    %c0_i32 = arith.constant 0 : i32
    return %arg2, %arg1 : i32, i32
  }
  func.func @transform_2(%arg0: i32, %arg1: i32, %arg2: i32) -> (i32, i32) {
    %c0_i32 = arith.constant 0 : i32
    %c0_i32_0 = arith.constant 0 : i32
    return %c0_i32, %arg1 : i32, i32
  }
  func.func @transform_3(%arg0: i32, %arg1: i32, %arg2: i32) -> (i32, i32) {
    %c0_i32 = arith.constant 0 : i32
    return %arg0, %arg1 : i32, i32
  }
}

</mosaic_0001>

<bundles_post_ra>
// kernel: tpu_custom_call.1
= control target key start
LH: loop header
LB: loop body
LE: loop exit
PB: predicated region body
PF: predicated region fallthrough
CT: control target
= control target key end

     0   :  { %8 = vsyncpa [#allocation4], 0  ;;  %s316_s0 = inlined_call_operand.hbm [shape: f32[16,32], index: 0, kind: input, shape index: {}]   ;;  %s317_s1 = inlined_call_operand.hbm [shape: f32[32,128], index: 1, kind: input, shape index: {}]   ;;  %s318_s2 = inlined_call_operand.vmem [shape: f32[1,128], index: 2, kind: input, shape index: {}]   ;;  %s319_s3 = inlined_call_operand.hbm [shape: f32[16,128], index: 3, kind: output, shape index: {}]  }
   0x1   :  { %9 = vsyncpa [#allocation7], 0 }
   0x2   :  { %10 = vsyncpa [#allocation5], 0  ;;  %s268_s12 = smov [#allocation3]  }
   0x3   :  { %s16_s13 = sshll.u32 %s268_s12, 4  ;;  %s17_s13 = int_to_ptr.vmem [resolvable:$true] %s16_s13 }
   0x4   :  { %s210_s14 = scalar_lea.vmem %s17_s13, 256  ;;  %p215_p1 = scmp.lt.s32.totalorder %s17_s13, %s17_s13 }
   0x5   :  { %p211_p0 = scmp.ne.s32.totalorder %s17_s13, %s210_s14  ;;  %p216_p2 = scmp.lt.s32.totalorder %s210_s14, %s210_s14 }
   0x7   :  { %p217_p3 = por %p216_p2, %p215_p1 }
   0x9   :  { %p218_p4 = pnand %p217_p3, %p211_p0 }
   0xb   :  { %221 = shalt.err (!%p218_p4)
}
   0xc   :  { %s269_s15 = smov 128   ;;  %s270_s16 = smov 8  }
   0xd   :  { %22 = dma.hbm_to_vmem [thread:$0]  %s316_s0, 256, %s17_s13, [#allocation4], %s269_s15, %s269_s15, %s270_s16  }
   0xe   :  { %s271_s19 = smov [#allocation6]  }
   0xf   :  { %s28_s20 = sshll.u32 %s271_s19, 4  ;;  %s29_s20 = int_to_ptr.vmem [resolvable:$true] %s28_s20 }
  0x10   :  { %s230_s21 = scalar_lea.vmem %s29_s20, 512  ;;  %p235_p6 = scmp.lt.s32.totalorder %s29_s20, %s29_s20 }
  0x11   :  { %p231_p5 = scmp.ne.s32.totalorder %s29_s20, %s230_s21  ;;  %p236_p7 = scmp.lt.s32.totalorder %s230_s21, %s230_s21 }
  0x13   :  { %p237_p8 = por %p236_p7, %p235_p6 }
  0x15   :  { %p238_p9 = pnand %p237_p8, %p231_p5 }
  0x17   :  { %241 = shalt.err (!%p238_p9)
}
  0x18   :  { %34 = dma.hbm_to_vmem [thread:$0]  %s317_s1, 512, %s29_s20, [#allocation7], %s269_s15, %s269_s15, %s270_s16  }
  0x19   :  { %262 = dma.done.wait [#allocation4], 256  }
  0x1a   :  { %263 = vsyncadd [#allocation4], 4294967040 }
  0x1b   :  { %264 = dma.done.wait [#allocation7], 512  }
  0x1c   :  { %265 = vsyncadd [#allocation7], 4294966784  ;;  %vm57_vm0 = vcmask 261120   ;;  %v56_v0 = vld [vmem:[#allocation6 + $0x18] sm:$0xff]  ;;  %v55_v1 = vld [vmem:[#allocation6 + $0x10] sm:$0xff]  ;;  %s272_s24 = smov [#allocation8]  }
  0x1d   :  { %186 = vmatprep.subr.mxu0 %v56_v0  ;;  %v51_v2 = vld [vmem:[#allocation3] sm:$0xff]  ;;  %v54_v3 = vld [vmem:[#allocation6 + $0x8] sm:$0xff]  ;;  %v53_v4 = vld [vmem:[#allocation6] sm:$0xff]  ;;  %s164_s25 = sshll.u32 %s272_s24, 4  ;;  %s165_s25 = int_to_ptr.vmem [resolvable:$true] %s164_s25 }
  0x1e   :  { %187 = vmatpush3.msra.mxu0 %v56_v0  ;;  %194 = vmatprep.mubr.msk.f32.mxu0 %vm57_vm0, %v51_v2  ;;  %v52_v5 = vld [vmem:[#allocation3 + $0x8] sm:$0xff]  ;;  %v179_v6 = vld [vmem:[%s318_s2] ss:$0 sm:$0xff]  ;;  %s242_s26 = scalar_lea.vmem %s165_s25, 256  ;;  %p247_p11 = scmp.lt.s32.totalorder %s165_s25, %s165_s25 }
  0x1f   :  { %188 = vmatprep.subr.mxu0 %v55_v1  ;;  %p243_p10 = scmp.ne.s32.totalorder %s165_s25, %s242_s26  ;;  %p248_p12 = scmp.lt.s32.totalorder %s242_s26, %s242_s26 }
  0x20   :  { %189 = vmatpush3.msra.mxu0 %v55_v1 }
  0x21   :  { %190 = vmatprep.subr.mxu0 %v54_v3  ;;  %p249_p13 = por %p248_p12, %p247_p11 }
  0x22   :  { %191 = vmatpush3.msra.mxu0 %v54_v3 }
  0x23   :  { %192 = vmatprep.subr.mxu0 %v53_v4  ;;  %p250_p0 = pnand %p249_p13, %p243_p10 }
  0x24   :  { %193 = vmatpush3.msra.mxu0 %v53_v4 }
  0x25   :  { %195 = vmatmul.mubr.msk.f32.vlgmr.msra.gmra.mxu0 %vm57_vm0, %v52_v5 }
  0xe5   :  { %v196_v7 = vpop.f32.mrf.mxu0 }
  0xe6   :  { %v156_v8 = vadd.f32 %v196_v7, %v179_v6 }
  0xe7   :  { %v130_v9 = vpop.f32.mrf.mxu0 }
  0xe8   :  { %158 = vst [vmem:[#allocation8 + $0x8] sm:$0xff] %v156_v8  ;;  %v155_v10 = vadd.f32 %v179_v6, %v130_v9 }
  0xea   :  { %157 = vst [vmem:[#allocation8] sm:$0xff] %v155_v10 }
  0xeb   :  { %253 = shalt.err (!%p250_p0)
}
  0xec   :  { %170 = dma.vmem_to_hbm [thread:$0]  %s165_s25, 256, %s319_s3, [#allocation5], %s269_s15, %s269_s15, %s270_s16  }
  0xed   :  { %266 = dma.done.wait [#allocation5], 256  }
  0xee   :  { %267 = vsyncadd [#allocation5], 4294967040 }
  0xef   :  { %174 = vsyncpa [#allocation4], 1 }
  0xf0   :  { %175 = vsyncpa [#allocation7], 1 }
  0xf1   :  { %176 = vsyncpa [#allocation5], 1 }

</bundles_post_ra>
